<compile_context>
chip_gen: v5e
topology: v5e:2x2
jax: 0.10.0
libtpu: 0.0.40
codegen_flags: <defaults>
</compile_context>

<pallas_src>
from functools import partial

import jax
import jax.numpy as jnp
from jax.experimental import pallas as pl
from jax.experimental.pallas import tpu as pltpu


def _round_up(x, m):
    return ((x + m - 1) // m) * m


# ----------------------------------------------------------------------------
# Exact(-enough) GELU inside the kernel.
# erf via Abramowitz & Stegun 7.1.26 (|err| < 1.5e-7, i.e. f32-exact for GELU);
# built from exp/abs/where so Mosaic lowering is guaranteed.
# ----------------------------------------------------------------------------
def _erf_f32(x):
    a1, a2, a3, a4, a5 = (0.254829592, -0.284496736, 1.421413741,
                          -1.453152027, 1.061405429)
    p = 0.3275911
    ax = jnp.abs(x)
    t = 1.0 / (1.0 + p * ax)
    poly = ((((a5 * t + a4) * t + a3) * t + a2) * t + a1) * t
    y = 1.0 - poly * jnp.exp(-ax * ax)
    return jnp.where(x < 0, -y, y)


def _gelu_exact(x):
    return 0.5 * x * (1.0 + _erf_f32(x * 0.7071067811865476))


# ----------------------------------------------------------------------------
# Fused, tiled matmul kernel:  out = [residual +] act( LN?(x) @ w + b )
# ----------------------------------------------------------------------------
def _fused_matmul_kernel(x_ref, w_ref, b_ref, *rest, has_ln, has_res, act, ln_eps):
    idx = 0
    if has_ln:
        ln_w_ref, ln_b_ref = rest[idx], rest[idx + 1]
        idx += 2
    if has_res:
        res_ref = rest[idx]
        idx += 1
    o_ref, acc_ref = rest[idx], rest[idx + 1]

    k = pl.program_id(2)

    @pl.when(k == 0)
    def _():
        acc_ref[...] = jnp.zeros_like(acc_ref)

    if has_ln:
        # LayerNorm in f32 (full feature axis is in this block), then cast to
        # the MXU input dtype.
        xf = x_ref[...].astype(jnp.float32)
        mean = jnp.mean(xf, axis=-1, keepdims=True)
        var = jnp.mean((xf - mean) ** 2, axis=-1, keepdims=True)  # biased (torch LN)
        xf = (xf - mean) * jax.lax.rsqrt(var + ln_eps) * ln_w_ref[...] + ln_b_ref[...]
        x = xf.astype(w_ref.dtype)
    else:
        x = x_ref[...]

    acc_ref[...] += jnp.dot(x, w_ref[...], preferred_element_type=jnp.float32)

    @pl.when(k == pl.num_programs(2) - 1)
    def _():
        out = acc_ref[...] + b_ref[...].astype(jnp.float32)
        if act == "gelu":
            out = _gelu_exact(out)
        if has_res:
            out = out + res_ref[...].astype(jnp.float32)
        o_ref[...] = out.astype(o_ref.dtype)


def fused_matmul(x, w, b, *, ln=None, act=None, residual=None,
                 out_dtype=jnp.float32, tm=256, tn=256, tk=512):
    """x: (M, K), w: (K, N), b: (N,). Optional fused LN (over K), GELU, residual."""
    M, K = x.shape
    N = w.shape[1]

    w = w.astype(jnp.bfloat16)
    if ln is None:
        x = x.astype(jnp.bfloat16)  # LN-fused path keeps x f32 for the statistics

    Mp = _round_up(M, 8)
    tm_eff = min(tm, Mp)
    Mp = _round_up(Mp, tm_eff)

    Np = _round_up(N, 128)
    tn_eff = min(tn, Np)
    Np = _round_up(Np, tn_eff)

    if ln is not None:
        # LN statistics need the un-padded feature axis -> full-K blocks.
        Kp = K
        tk_eff = K
    else:
        Kp = _round_up(K, 128)
        tk_eff = min(tk, Kp)
        Kp = _round_up(Kp, tk_eff)

    if (Mp, Kp) != (M, K):
        x = jnp.pad(x, ((0, Mp - M), (0, Kp - K)))
    if (Kp, Np) != (K, N):
        w = jnp.pad(w, ((0, Kp - K), (0, Np - N)))
    b2 = b.astype(jnp.float32)
    if Np != N:
        b2 = jnp.pad(b2, (0, Np - N))
    b2 = b2.reshape(1, Np)

    inputs = [x, w, b2]
    in_specs = [
        pl.BlockSpec((tm_eff, tk_eff), lambda i, j, kk: (i, kk)),
        pl.BlockSpec((tk_eff, tn_eff), lambda i, j, kk: (kk, j)),
        pl.BlockSpec((1, tn_eff), lambda i, j, kk: (0, j)),
    ]
    if ln is not None:
        ln_w, ln_b = ln
        inputs += [ln_w.reshape(1, K).astype(jnp.float32),
                   ln_b.reshape(1, K).astype(jnp.float32)]
        in_specs += [pl.BlockSpec((1, Kp), lambda i, j, kk: (0, 0)),
                     pl.BlockSpec((1, Kp), lambda i, j, kk: (0, 0))]
    if residual is not None:
        r = residual.astype(jnp.float32)
        if (Mp, Np) != r.shape:
            r = jnp.pad(r, ((0, Mp - M), (0, Np - N)))
        inputs.append(r)
        in_specs.append(pl.BlockSpec((tm_eff, tn_eff), lambda i, j, kk: (i, j)))

    kern = partial(_fused_matmul_kernel, has_ln=ln is not None,
                   has_res=residual is not None, act=act, ln_eps=1e-5)

    out = pl.pallas_call(
        kern,
        out_shape=jax.ShapeDtypeStruct((Mp, Np), out_dtype),
        grid=(Mp // tm_eff, Np // tn_eff, Kp // tk_eff),
        in_specs=in_specs,
        out_specs=pl.BlockSpec((tm_eff, tn_eff), lambda i, j, kk: (i, j)),
        scratch_shapes=[pltpu.VMEM((tm_eff, tn_eff), jnp.float32)],
        compiler_params=pltpu.CompilerParams(
            dimension_semantics=("parallel", "parallel", "arbitrary"),
            vmem_limit_bytes=48 * 1024 * 1024,  # headroom-safe on v7x's 64 MiB
        ),
    )(*inputs)

    if (Mp, Np) != (M, N):
        out = out[:M, :N]
    return out


# ----------------------------------------------------------------------------
# Row-tiled LayerNorm (final encoder norm)
# ----------------------------------------------------------------------------
def _layernorm_kernel(x_ref, w_ref, b_ref, o_ref, *, eps):
    x = x_ref[...].astype(jnp.float32)
    mean = jnp.mean(x, axis=-1, keepdims=True)
    var = jnp.mean((x - mean) ** 2, axis=-1, keepdims=True)
    o_ref[...] = ((x - mean) * jax.lax.rsqrt(var + eps) * w_ref[...]
                  + b_ref[...]).astype(o_ref.dtype)


def layernorm(x2d, w, b, eps=1e-5, tm=256):
    M, D = x2d.shape
    Mp = _round_up(M, 8)
    tm_eff = min(tm, Mp)
    Mp = _round_up(Mp, tm_eff)
    xp = jnp.pad(x2d, ((0, Mp - M), (0, 0))) if Mp != M else x2d
    out = pl.pallas_call(
        partial(_layernorm_kernel, eps=eps),
        out_shape=jax.ShapeDtypeStruct((Mp, D), jnp.float32),
        grid=(Mp // tm_eff,),
        in_specs=[
            pl.BlockSpec((tm_eff, D), lambda i: (i, 0)),
            pl.BlockSpec((1, D), lambda i: (0, 0)),
            pl.BlockSpec((1, D), lambda i: (0, 0)),
        ],
        out_specs=pl.BlockSpec((tm_eff, D), lambda i: (i, 0)),
        compiler_params=pltpu.CompilerParams(dimension_semantics=("parallel",)),
    )(xp, w.reshape(1, D), b.reshape(1, D))
    return out[:M] if Mp != M else out


# ----------------------------------------------------------------------------
# Attention: consumes (B, N, 3E) QKV directly, all heads per grid step.
# ----------------------------------------------------------------------------
def _attention_kernel(qkv_ref, mask_ref, o_ref, *, num_heads, scale):
    qkv = qkv_ref[0]                     # (N, 3E) bf16
    m = mask_ref[0]                      # (1, N) f32 key mask for this batch elem
    E = qkv.shape[1] // 3
    Dh = E // num_heads
    neg = jnp.float32(-1e12)
    outs = []
    # TODO(synk): for very long sequences, tile the KV axis with an online
    # (flash-style) softmax to cap the (N, N) score footprint on v7x VMEM.
    for h in range(num_heads):
        q = qkv[:, h * Dh:(h + 1) * Dh]
        k = qkv[:, E + h * Dh:E + (h + 1) * Dh]
        v = qkv[:, 2 * E + h * Dh:2 * E + (h + 1) * Dh]
        s = jax.lax.dot_general(q, k, (((1,), (1,)), ((), ())),
                                preferred_element_type=jnp.float32) * scale
        s = jnp.where(m > 0.5, s, neg)   # masked_fill(~mask, -1e12) over keys
        s = s - jnp.max(s, axis=-1, keepdims=True)
        e = jnp.exp(s)
        p = e * pl.reciprocal(jnp.sum(e, axis=-1, keepdims=True), approx=True)
        outs.append(jax.lax.dot_general(p.astype(qkv.dtype), v,
                                        (((1,), (0,)), ((), ())),
                                        preferred_element_type=jnp.float32))
    # Single lane-dense (N, E) store instead of per-head narrow stores.
    o_ref[0] = jnp.concatenate(outs, axis=-1).astype(o_ref.dtype)


def attention(qkv, mask3, num_heads, scale):
    """qkv: (B, N, 3E) bf16; mask3: (B, 1, N) f32 {0,1}. Returns (B, N, E) bf16."""
    B, N, E3 = qkv.shape
    E = E3 // 3
    kern = partial(_attention_kernel, num_heads=num_heads, scale=scale)
    return pl.pallas_call(
        kern,
        out_shape=jax.ShapeDtypeStruct((B, N, E), jnp.bfloat16),
        grid=(B,),
        in_specs=[
            pl.BlockSpec((1, N, E3), lambda b: (b, 0, 0)),
            pl.BlockSpec((1, 1, N), lambda b: (b, 0, 0)),
        ],
        out_specs=pl.BlockSpec((1, N, E), lambda b: (b, 0, 0)),
        compiler_params=pltpu.CompilerParams(
            dimension_semantics=("parallel",),
            vmem_limit_bytes=48 * 1024 * 1024,
        ),
    )(qkv, mask3)


# ----------------------------------------------------------------------------
# Model pieces (glue = reshapes / broadcast adds; matmuls, norms, attention in Pallas)
# ----------------------------------------------------------------------------
def video_patch_embed(video, w, b, ps):
    b_, t, c, h, wd = video.shape
    hp, wp = h // ps, wd // ps
    x = video.reshape(b_ * t, c, hp, ps, wp, ps)
    x = x.transpose(0, 2, 4, 1, 3, 5).reshape(b_ * t * hp * wp, c * ps * ps)
    y = fused_matmul(x, w, b, out_dtype=jnp.float32)
    return y.reshape(b_, t * hp * wp, w.shape[1]), hp * wp


def audio_patch_embed(audio, w, b, aps):
    B, C, H, W = audio.shape
    ph, pw = aps
    hp, wp = H // ph, W // pw
    x = audio.reshape(B, C, hp, ph, wp, pw)
    x = x.transpose(0, 2, 4, 1, 3, 5).reshape(B * hp * wp, C * ph * pw)
    y = fused_matmul(x, w, b, out_dtype=jnp.float32)
    return y.reshape(B, hp * wp, w.shape[1])


def get_patch_mask_video(video, ps):
    b, t, c, h, w = video.shape
    x = video.mean(axis=2)
    x = x.reshape(b, t, h // ps, ps, w // ps, ps).mean(axis=(3, 5))
    return x.reshape(b, -1) != -1.0


def get_patch_mask_audio(audio, aps):
    B, C, H, W = audio.shape
    x = audio.mean(axis=1)
    x = x.reshape(B, H // aps[0], aps[0], W // aps[1], aps[1]).mean(axis=(2, 4))
    return x.reshape(B, -1) != -1.0


def block_forward(x2d, B, N, enc_mask3, p, num_heads):
    M, C = x2d.shape
    Dh = C // num_heads
    scale = Dh ** -0.5

    # --- attention branch: LN1 fused into QKV matmul; residual fused into proj
    qkv = fused_matmul(x2d, p["qkv_w"], p["qkv_b"],
                       ln=(p["norm1_w"], p["norm1_b"]), out_dtype=jnp.bfloat16)
    a = attention(qkv.reshape(B, N, 3 * C), enc_mask3, num_heads, scale)
    x2d = fused_matmul(a.reshape(M, C), p["proj_w"], p["proj_b"],
                       residual=x2d, out_dtype=jnp.float32)

    # --- MLP branch: LN2 + GELU fused into fc1; residual fused into fc2
    h = fused_matmul(x2d, p["fc1_w"], p["fc1_b"],
                     ln=(p["norm2_w"], p["norm2_b"]), act="gelu",
                     out_dtype=jnp.bfloat16)
    x2d = fused_matmul(h, p["fc2_w"], p["fc2_b"],
                       residual=x2d, out_dtype=jnp.float32)
    return x2d


def tvlt_forward(params, audio, video, cfg):
    """TVLT.forward(audio=..., video=..., mask_visual=False, use_mae=False)."""
    E = cfg["embed_dim"]
    aps = cfg["audio_patch_size"]
    ps = cfg["patch_size"]
    fp = cfg["frequency_size"] // aps[1]  # freq_patch_size

    # ---- audio tokens ----
    x_a = audio_patch_embed(audio, params["patch_a_w"], params["patch_a_b"], aps)
    B, La, _ = x_a.shape
    x_a = x_a + jnp.tile(params["freq_embed"], (1, La // fp, 1))
    x_a = x_a + jnp.repeat(params["pos_embed_a"][:, : La // fp], fp, axis=1)
    x_a = x_a + params["type_embed_a"]
    mask_a = get_patch_mask_audio(audio, aps)

    # ---- video tokens ----
    b, t, c, h, w = video.shape
    x_v, frame_patch_len = video_patch_embed(
        video, params["patch_v_w"], params["patch_v_b"], ps
    )
    x_v = x_v + jnp.tile(params["pos_embed_v"], (1, t, 1))
    x_v = x_v + jnp.repeat(
        params["temporal_embed"][:, : cfg["num_frames"]], frame_patch_len, axis=1
    )
    x_v = x_v + params["type_embed_v"]
    mask_v = get_patch_mask_video(video, ps)

    # ---- concat [cls, audio, video] ----
    enc_mask = jnp.concatenate([mask_a[:, :1], mask_a, mask_v], axis=1).astype(
        jnp.float32
    )
    cls = jnp.broadcast_to(params["cls_token"], (B, 1, E))
    x = jnp.concatenate([cls, x_a, x_v], axis=1)
    B_, N, _ = x.shape
    enc_mask3 = enc_mask.reshape(B_, 1, N)
    x2d = x.reshape(B_ * N, E)  # residual stream stays f32 (M, E)

    # ---- transformer encoder ----
    for blk in params["blocks"]:
        x2d = block_forward(x2d, B_, N, enc_mask3, blk, cfg["num_heads"])

    x2d = layernorm(x2d, params["norm_w"], params["norm_b"])
    return (x2d.reshape(B_, N, E), None, None, None, None, None)


# ----------------------------------------------------------------------------
# Deterministic parameter init (mirrors TVLT.init_weights: normal std=0.02,
# zero biases, unit LayerNorm scales)
# ----------------------------------------------------------------------------
def init_params(key, cfg):
    E = cfg["embed_dim"]
    ps = cfg["patch_size"]
    aps = cfg["audio_patch_size"]
    in_chans = cfg["in_chans"]
    num_patches_v = (cfg["img_size"] // ps) ** 2
    fp = cfg["frequency_size"] // aps[1]
    hidden = int(E * cfg["mlp_ratio"])

    keys = iter(jax.random.split(key, 16 + 8 * cfg["depth"]))

    def nrm(shape, std=0.02):
        return (std * jax.random.normal(next(keys), shape)).astype(jnp.float32)

    params = {
        # conv weights stored pre-flattened as (C*kh*kw, E) for X @ W
        "patch_v_w": nrm((in_chans * ps * ps, E)),
        "patch_v_b": jnp.zeros((E,), jnp.float32),
        "patch_a_w": nrm((1 * aps[0] * aps[1], E)),
        "patch_a_b": jnp.zeros((E,), jnp.float32),
        "cls_token": nrm((1, 1, E)),
        "type_embed_v": nrm((1, 1, E)),
        "type_embed_a": nrm((1, 1, E)),
        "pos_embed_v": nrm((1, num_patches_v, E)),
        "pos_embed_a": nrm((1, cfg["max_audio_patches"], E)),
        "temporal_embed": nrm((1, cfg["max_frames"], E)),
        "freq_embed": nrm((1, fp, E)),
        "norm_w": jnp.ones((E,), jnp.float32),
        "norm_b": jnp.zeros((E,), jnp.float32),
        "blocks": [],
    }
    for _ in range(cfg["depth"]):
        params["blocks"].append(
            {
                "norm1_w": jnp.ones((E,), jnp.float32),
                "norm1_b": jnp.zeros((E,), jnp.float32),
                "qkv_w": nrm((E, 3 * E)),
                "qkv_b": jnp.zeros((3 * E,), jnp.float32),
                "proj_w": nrm((E, E)),
                "proj_b": jnp.zeros((E,), jnp.float32),
                "norm2_w": jnp.ones((E,), jnp.float32),
                "norm2_b": jnp.zeros((E,), jnp.float32),
                "fc1_w": nrm((E, hidden)),
                "fc1_b": jnp.zeros((hidden,), jnp.float32),
                "fc2_w": nrm((hidden, E)),
                "fc2_b": jnp.zeros((E,), jnp.float32),
            }
        )
    return params


# ----------------------------------------------------------------------------
if __name__ == "__main__":
    cfg = dict(
        img_size=16,
        patch_size=8,
        in_chans=3,
        audio_patch_size=(2, 8),
        frequency_size=16,
        embed_dim=32,
        num_heads=4,
        depth=2,
        mlp_ratio=4,
        max_frames=4,
        num_frames=2,
        max_audio_patches=8,
        hidden_size=32,
    )

    root = jax.random.PRNGKey(0)
    k_params, k_video, k_audio = jax.random.split(root, 3)

    params = init_params(k_params, cfg)
    video = jax.random.normal(k_video, (2, 2, 3, 16, 16), jnp.float32)  # (B,T,C,H,W)
    audio = jax.random.normal(k_audio, (2, 1, 4, 16), jnp.float32)      # (B,1,T,F)

    out = tvlt_forward(params, audio, video, cfg)[0]
    jax.block_until_ready(out)
    assert out.shape == (2, 1 + 4 + 2 * 4, cfg["embed_dim"])
    assert jnp.all(jnp.isfinite(out))
    print("KERNEL_OK")
</pallas_src>

<mosaic_0001>
module attributes {stable_mosaic.version = 11 : i64} {
  func.func @_fused_matmul_kernel(%arg0: i32, %arg1: i32, %arg2: i32, %arg3: memref<8x128xbf16, #tpu.memory_space<vmem>>, %arg4: memref<128x128xbf16, #tpu.memory_space<vmem>>, %arg5: memref<1x128xf32, #tpu.memory_space<vmem>>, %arg6: memref<8x128xf32, #tpu.memory_space<vmem>>, %arg7: memref<8x128xf32, #tpu.memory_space<vmem>>) attributes {dimension_semantics = [#tpu.dimension_semantics<parallel>, #tpu.dimension_semantics<parallel>, #tpu.dimension_semantics<arbitrary>], iteration_bounds = array<i64: 1, 1, 1>, scalar_prefetch = 0 : i64, scratch_operands = 1 : i64, tpu.core_type = #tpu.core_type<tc>, window_params = [{transform_indices = @transform_0, window_bounds = array<i64: 8, 128>}, {transform_indices = @transform_1, window_bounds = array<i64: 128, 128>}, {transform_indices = @transform_2, window_bounds = array<i64: 1, 128>}, {transform_indices = @transform_3, window_bounds = array<i64: 8, 128>}]} {
    %c0_i32 = arith.constant 0 : i32
    %0 = arith.cmpi eq, %arg2, %c0_i32 : i32
    %1 = arith.extui %0 : i1 to i32
    %c0_i32_0 = arith.constant 0 : i32
    %2 = arith.cmpi ne, %1, %c0_i32_0 : i32
    scf.if %2 {
      %cst_10 = arith.constant 0.000000e+00 : f32
      %12 = vector.broadcast %cst_10 : f32 to vector<8x128xf32>
      %c0_11 = arith.constant 0 : index
      %c0_12 = arith.constant 0 : index
      %13 = vector.load %arg7[%c0_11, %c0_12] : memref<8x128xf32, #tpu.memory_space<vmem>>, vector<8x128xf32>
      tpu.vector_store %arg7[%c0_11, %c0_12], %12 {strides = array<i32>} : memref<8x128xf32, #tpu.memory_space<vmem>>, vector<8x128xf32>,
    } else {
    }
    %c0 = arith.constant 0 : index
    %c0_1 = arith.constant 0 : index
    %3 = vector.load %arg3[%c0, %c0_1] : memref<8x128xbf16, #tpu.memory_space<vmem>>, vector<8x128xbf16>
    %c0_2 = arith.constant 0 : index
    %c0_3 = arith.constant 0 : index
    %4 = vector.load %arg7[%c0_2, %c0_3] : memref<8x128xf32, #tpu.memory_space<vmem>>, vector<8x128xf32>
    %c0_4 = arith.constant 0 : index
    %c0_5 = arith.constant 0 : index
    %5 = vector.load %arg4[%c0_4, %c0_5] : memref<128x128xbf16, #tpu.memory_space<vmem>>, vector<128x128xbf16>
    %cst = arith.constant dense<0.000000e+00> : vector<8x128xf32>
    %6 = tpu.matmul %3, %5, %cst {dimension_numbers = #tpu.dot_dimension_numbers<[1], [0], [0], [1], [0, 0, 1, 1], [], []>} : vector<8x128xbf16>, vector<128x128xbf16>, vector<8x128xf32> -> vector<8x128xf32>
    %7 = arith.addf %4, %6 : vector<8x128xf32>
    %c0_6 = arith.constant 0 : index
    %c0_7 = arith.constant 0 : index
    %8 = vector.load %arg7[%c0_6, %c0_7] : memref<8x128xf32, #tpu.memory_space<vmem>>, vector<8x128xf32>
    tpu.vector_store %arg7[%c0_6, %c0_7], %7 {strides = array<i32>} : memref<8x128xf32, #tpu.memory_space<vmem>>, vector<8x128xf32>,
    %c0_i32_8 = arith.constant 0 : i32
    %9 = arith.cmpi eq, %arg2, %c0_i32_8 : i32
    %10 = arith.extui %9 : i1 to i32
    %c0_i32_9 = arith.constant 0 : i32
    %11 = arith.cmpi ne, %10, %c0_i32_9 : i32
    scf.if %11 {
      %c0_10 = arith.constant 0 : index
      %c0_11 = arith.constant 0 : index
      %12 = vector.load %arg7[%c0_10, %c0_11] : memref<8x128xf32, #tpu.memory_space<vmem>>, vector<8x128xf32>
      %c0_12 = arith.constant 0 : index
      %c0_13 = arith.constant 0 : index
      %13 = vector.load %arg5[%c0_12, %c0_13] : memref<1x128xf32, #tpu.memory_space<vmem>>, vector<1x128xf32>
      %14 = vector.broadcast %13 : vector<1x128xf32> to vector<8x128xf32>
      %15 = arith.addf %12, %14 : vector<8x128xf32>
      %c0_14 = arith.constant 0 : index
      %c0_15 = arith.constant 0 : index
      %16 = vector.load %arg6[%c0_14, %c0_15] : memref<8x128xf32, #tpu.memory_space<vmem>>, vector<8x128xf32>
      tpu.vector_store %arg6[%c0_14, %c0_15], %15 {strides = array<i32>} : memref<8x128xf32, #tpu.memory_space<vmem>>, vector<8x128xf32>,
    } else {
    }
    return
  }
  func.func @transform_0(%arg0: i32, %arg1: i32, %arg2: i32) -> (i32, i32) {
    %c0_i32 = arith.constant 0 : i32
    return %arg0, %arg2 : i32, i32
  }
  func.func @transform_1(%arg0: i32, %arg1: i32, %arg2: i32) -> (i32, i32) {
    %c0_i32 = arith.constant 0 : i32
    return %arg2, %arg1 : i32, i32
  }
  func.func @transform_2(%arg0: i32, %arg1: i32, %arg2: i32) -> (i32, i32) {
    %c0_i32 = arith.constant 0 : i32
    %c0_i32_0 = arith.constant 0 : i32
    return %c0_i32, %arg1 : i32, i32
  }
  func.func @transform_3(%arg0: i32, %arg1: i32, %arg2: i32) -> (i32, i32) {
    %c0_i32 = arith.constant 0 : i32
    return %arg0, %arg1 : i32, i32
  }
}

</mosaic_0001>

<bundles_post_ra>
// kernel: tpu_custom_call.1
= control target key start
LH: loop header
LB: loop body
LE: loop exit
PB: predicated region body
PF: predicated region fallthrough
CT: control target
= control target key end

     0   :  { %8 = vsyncpa [#allocation4], 0  ;;  %s320_s0 = inlined_call_operand.hbm [shape: bf16[8,128], index: 0, kind: input, shape index: {}]   ;;  %s321_s1 = inlined_call_operand.hbm [shape: bf16[128,128], index: 1, kind: input, shape index: {}]   ;;  %s322_s2 = inlined_call_operand.vmem [shape: f32[1,128], index: 2, kind: input, shape index: {}]   ;;  %s323_s3 = inlined_call_operand.hbm [shape: f32[8,128], index: 3, kind: output, shape index: {}]  }
   0x1   :  { %9 = vsyncpa [#allocation7], 0 }
   0x2   :  { %10 = vsyncpa [#allocation5], 0  ;;  %s16_s14 = sshll.u32 %s320_s0, 4  ;;  %s283_s15 = smov [#allocation3]   ;;  %s17_s14 = int_to_ptr.hbm [resolvable:$true] %s16_s14 }
   0x3   :  { %s18_s16 = sshll.u32 %s283_s15, 4  ;;  %s26_s19 = sshll.u32 %s321_s1, 4  ;;  %s19_s16 = int_to_ptr.vmem [resolvable:$true] %s18_s16  ;;  %s27_s19 = int_to_ptr.hbm [resolvable:$true] %s26_s19 }
   0x4   :  { %21 = dma.hbm_to_vmem [thread:$0]  %s17_s14, 64, %s19_s16, [#allocation4]  }
   0x5   :  { %s284_s20 = smov [#allocation6]   ;;  %s285_s22 = smov 64  }
   0x6   :  { %s28_s21 = sshll.u32 %s284_s20, 4  ;;  %s286_s23 = smov 4   ;;  %s29_s21 = int_to_ptr.vmem [resolvable:$true] %s28_s21 }
   0x7   :  { %34 = dma.hbm_to_vmem [thread:$0]  %s27_s19, 1024, %s29_s21, [#allocation7], %s285_s22, %s285_s22, %s286_s23  }
   0x8   :  { %277 = dma.done.wait [#allocation4], 64  }
   0x9   :  { %278 = vsyncadd [#allocation4], 4294967232 }
   0xa   :  { %279 = dma.done.wait [#allocation7], 1024  }
   0xb   :  { %280 = vsyncadd [#allocation7], 4294966272  ;;  %v198_v0 = vld [vmem:[#allocation6 + $0x38] sm:$0xff]  ;;  %v197_v1 = vld [vmem:[#allocation6 + $0x30] sm:$0xff]  ;;  %s287_s24 = smov [#allocation8]   ;;  %s148_s28 = sshll.u32 %s323_s3, 4  ;;  %s149_s28 = int_to_ptr.hbm [resolvable:$true] %s148_s28 }
   0xc   :  { %116 = vmatpush.bf16.msra.mxu0 %v198_v0  ;;  %v196_v2 = vld [vmem:[#allocation6 + $0x28] sm:$0xff]  ;;  %v195_v3 = vld [vmem:[#allocation6 + $0x20] sm:$0xff]  ;;  %v194_v4 = vld [vmem:[#allocation6 + $0x18] sm:$0xff]  ;;  %s146_s25 = sshll.u32 %s287_s24, 4  ;;  %s147_s25 = int_to_ptr.vmem [resolvable:$true] %s146_s25 }
   0xd   :  { %v193_v5 = vld [vmem:[#allocation6 + $0x10] sm:$0xff]  ;;  %v192_v6 = vld [vmem:[#allocation6 + $0x8] sm:$0xff]  ;;  %v191_v7 = vld [vmem:[#allocation6] sm:$0xff] }
   0xe   :  { %v50_v8 = vld [vmem:[#allocation3] sm:$0xf] }
   0xf   :  { %v204_v9 = vld [vmem:[%s322_s2] ss:$0 sm:$0xff] }
  0x10   :  { %117 = vmatpush.bf16.msra.mxu0 %v197_v1 }
  0x14   :  { %118 = vmatpush.bf16.msra.mxu0 %v196_v2 }
  0x18   :  { %119 = vmatpush.bf16.msra.mxu0 %v195_v3 }
  0x1c   :  { %120 = vmatpush.bf16.msra.mxu0 %v194_v4 }
  0x20   :  { %121 = vmatpush.bf16.msra.mxu0 %v193_v5 }
  0x24   :  { %122 = vmatpush.bf16.msra.mxu0 %v192_v6 }
  0x28   :  { %123 = vmatpush.bf16.msra.mxu0 %v191_v7 }
  0x2b   :  { %124 = vmatmul.bf16.vlgmr.msra.gmra.mxu0 %v50_v8 }
  0xa8   :  { %v125_v10 = vpop.f32.mrf.mxu0 }
  0xa9   :  { %v139_v11 = vadd.f32 %v204_v9, %v125_v10 }
  0xab   :  { %140 = vst [vmem:[#allocation8] sm:$0xff] %v139_v11 }
  0xac   :  { %151 = dma.vmem_to_hbm [thread:$0]  %s147_s25, 128, %s149_s28, [#allocation5]  }
  0xb0   :  { %v127_v12 = vpop.f32.mrf.mxu0 }
  0xb1   :  { %281 = dma.done.wait [#allocation5], 128  }
  0xb2   :  { %282 = vsyncadd [#allocation5], 4294967168 }
  0xb3   :  { %156 = vsyncpa [#allocation4], 1 }
  0xb4   :  { %157 = vsyncpa [#allocation7], 1 }
  0xb5   :  { %158 = vsyncpa [#allocation5], 1 }

</bundles_post_ra>
